<compile_context>
chip_gen: v7x
topology: tpu7x:2x2x1
jax: 0.10.0
libtpu: 0.0.40
codegen_flags: <defaults>
</compile_context>

<pallas_src>
import functools

import jax
import jax.numpy as jnp
from jax import lax
from jax.experimental import pallas as pl
from jax.experimental.pallas import tpu as pltpu

LEAKY_SLOPE = 0.1
BN_EPS = 1e-5


def _cdiv(a, b):
    return -(-a // b)


# ------------------------------- kernels ---------------------------------- #

def _linear_bias_act_kernel(x_ref, w_ref, b_ref, o_ref, *, apply_relu):
    """o = leaky_relu(x @ w + b); weight-stationary, one MXU dot per row tile."""
    z = jnp.dot(x_ref[...].astype(w_ref.dtype), w_ref[...],
                preferred_element_type=jnp.float32)
    y = z + b_ref[...]
    if apply_relu:
        y = jnp.maximum(y, LEAKY_SLOPE * y)
    o_ref[...] = y.astype(o_ref.dtype)


def _linear_stats_kernel(x_ref, w_ref, sum_ref, sq_ref, *, n_valid, tile_m):
    """Per-row-tile partial per-channel sum / sum-of-squares of z = x @ w.

    No bias: it cancels exactly under train-mode BatchNorm.  Partial (ragged)
    row tiles are masked; the mask is compiled out entirely when tm divides N.
    """
    z = jnp.dot(x_ref[...].astype(w_ref.dtype), w_ref[...],
                preferred_element_type=jnp.float32)
    if n_valid % tile_m != 0:
        row = pl.program_id(0) * tile_m + lax.broadcasted_iota(jnp.int32, z.shape, 0)
        z = jnp.where(row < n_valid, z, 0.0)
    sum_ref[...] = jnp.sum(z, axis=0).reshape(1, 1, -1)
    sq_ref[...] = jnp.sum(z * z, axis=0).reshape(1, 1, -1)


def _linear_scale_shift_act_kernel(x_ref, w_ref, scale_ref, shift_ref, o_ref,
                                   *, apply_relu):
    """o = leaky_relu((x @ w) * scale + shift); BN folded into per-channel scale/shift."""
    z = jnp.dot(x_ref[...].astype(w_ref.dtype), w_ref[...],
                preferred_element_type=jnp.float32)
    y = z * scale_ref[...] + shift_ref[...]
    if apply_relu:
        y = jnp.maximum(y, LEAKY_SLOPE * y)
    o_ref[...] = y.astype(o_ref.dtype)


# ------------------------------- wrapper ----------------------------------- #

def shared_mlp_forward(x, wt, bias, *, use_bn, gamma=None, beta=None,
                       bn_bias=None, no_relu=False, tm=512):
    """Forward pass of SharedMLPBlock.

    x:    [N, in_dim]  float32
    wt:   [in_dim, out_dim]  transposed weight, already in the MXU compute dtype
    bias: [out_dim]    float32
    returns [N, out_dim] float32
    """
    n, in_dim = x.shape
    k_dim, c = wt.shape
    assert k_dim == in_dim

    if n <= tm:
        tm = n                      # single full-row tile (full-dim block is always legal)
    num_tiles = _cdiv(n, tm)        # ragged last tile handled by Pallas + in-kernel mask

    x_spec = pl.BlockSpec((tm, in_dim), lambda m: (m, 0))
    w_spec = pl.BlockSpec((in_dim, c), lambda m: (0, 0))        # weight-stationary
    vec_spec = pl.BlockSpec((1, c), lambda m: (0, 0))           # per-channel row
    o_spec = pl.BlockSpec((tm, c), lambda m: (m, 0))

    # VMEM budget from the actual block footprint (double-buffered), capped for v7x.
    # TODO(synk): very large in_dim*out_dim weights would need a K/C-tiled fallback.
    w_bytes = in_dim * c * jnp.dtype(wt.dtype).itemsize
    est = 2 * (tm * in_dim * jnp.dtype(x.dtype).itemsize + w_bytes + tm * c * 4) + 8 * c * 4
    params = pltpu.CompilerParams(
        dimension_semantics=("parallel",),
        vmem_limit_bytes=int(min(max(2 * est, 4 << 20), 32 << 20)))

    if not use_bn:
        # Fold the (zero-init) BatchNormBlock bias into the linear bias.
        b_total = bias if bn_bias is None else bias + bn_bias
        b_row = b_total.astype(jnp.float32).reshape(1, c)
        kernel = functools.partial(_linear_bias_act_kernel, apply_relu=not no_relu)
        return pl.pallas_call(
            kernel,
            out_shape=jax.ShapeDtypeStruct((n, c), jnp.float32),
            grid_spec=pltpu.PrefetchScalarGridSpec(
                num_scalar_prefetch=0, grid=(num_tiles,),
                in_specs=[x_spec, w_spec, vec_spec],
                out_specs=o_spec),
            compiler_params=params,
        )(x, wt, b_row)

    # ---------------- use_bn=True ----------------
    # Pass 1: per-row-tile partial statistics of z = x @ W^T (no y write-back).
    stats_kernel = functools.partial(_linear_stats_kernel, n_valid=n, tile_m=tm)
    stat_spec = pl.BlockSpec((1, 1, c), lambda m: (m, 0, 0))
    zsum, zsq = pl.pallas_call(
        stats_kernel,
        out_shape=(jax.ShapeDtypeStruct((num_tiles, 1, c), jnp.float32),
                   jax.ShapeDtypeStruct((num_tiles, 1, c), jnp.float32)),
        grid_spec=pltpu.PrefetchScalarGridSpec(
            num_scalar_prefetch=0, grid=(num_tiles,),
            in_specs=[x_spec, w_spec],
            out_specs=[stat_spec, stat_spec]),
        compiler_params=params,
    )(x, wt)

    # Tiny per-channel math (C floats) in JAX.  Train-mode BatchNorm1d uses batch
    # statistics with the biased variance; the linear bias cancels and is dropped.
    inv_n = 1.0 / float(n)
    mean = jnp.sum(zsum, axis=0).reshape(1, c) * inv_n
    ex2 = jnp.sum(zsq, axis=0).reshape(1, c) * inv_n
    var = jnp.maximum(ex2 - mean * mean, 0.0)
    inv_std = lax.rsqrt(var + BN_EPS)
    scale = gamma.astype(jnp.float32).reshape(1, c) * inv_std
    shift = beta.astype(jnp.float32).reshape(1, c) - mean * scale

    # Pass 2: recompute the matmul with scale/shift + LeakyReLU fused.
    apply_kernel = functools.partial(_linear_scale_shift_act_kernel,
                                     apply_relu=not no_relu)
    return pl.pallas_call(
        apply_kernel,
        out_shape=jax.ShapeDtypeStruct((n, c), jnp.float32),
        grid_spec=pltpu.PrefetchScalarGridSpec(
            num_scalar_prefetch=0, grid=(num_tiles,),
            in_specs=[x_spec, w_spec, vec_spec, vec_spec],
            out_specs=o_spec),
        compiler_params=params,
    )(x, wt, scale, shift)


class SharedMLPBlock:
    """JAX/Pallas mirror of the PyTorch SharedMLPBlock forward pass."""

    def __init__(self, in_dim, out_dim, use_bn, bn_momentum, no_relu=False, *,
                 key, compute_dtype=jnp.bfloat16):
        self.in_dim = in_dim
        self.out_dim = out_dim
        self.use_bn = use_bn
        self.bn_momentum = bn_momentum      # running-stats momentum (training-only state)
        self.no_relu = no_relu
        self.weight = jax.random.normal(key, (out_dim, in_dim), dtype=jnp.float32)
        self.bias = jnp.zeros((out_dim,), dtype=jnp.float32)
        # One-time transposed weight in the MXU compute dtype (no per-call
        # transpose/cast/pad round trips through HBM).
        self.wt = jnp.asarray(self.weight.T, dtype=compute_dtype)
        if use_bn:
            self.gamma = jnp.ones((out_dim,), dtype=jnp.float32)
            self.beta = jnp.zeros((out_dim,), dtype=jnp.float32)
            self.bn_bias = None
        else:
            self.gamma = None
            self.beta = None
            self.bn_bias = jnp.zeros((out_dim,), dtype=jnp.float32)

    def __call__(self, x, batch=None, tm=512):
        # TODO(synk): BatchNorm running_mean/running_var momentum updates are
        # training-state side effects and are not produced here (output matches
        # train-mode nn.BatchNorm1d, which uses batch statistics).
        return shared_mlp_forward(
            x, self.wt, self.bias, use_bn=self.use_bn,
            gamma=self.gamma, beta=self.beta, bn_bias=self.bn_bias,
            no_relu=self.no_relu, tm=tm)


# ------------------------------- self-test ---------------------------------- #

def _ref_forward(x, blk):
    """Pure-JAX reference using the same bf16-rounded operands as the kernel."""
    w = blk.wt.astype(jnp.float32)                               # (in, out), pre-rounded
    x_r = x.astype(blk.wt.dtype).astype(jnp.float32)
    z = x_r @ w
    if blk.use_bn:
        mean = z.mean(axis=0)
        var = z.var(axis=0)                                      # biased, train-mode BN
        y = (z - mean) / jnp.sqrt(var + BN_EPS) * blk.gamma + blk.beta
    else:
        y = z + blk.bias + blk.bn_bias
    if not blk.no_relu:
        y = jnp.maximum(y, LEAKY_SLOPE * y)
    return y


if __name__ == "__main__":
    key = jax.random.PRNGKey(0)
    k_x, k_w = jax.random.split(key)

    n, in_dim, out_dim = 256, 32, 64
    x = jax.random.normal(k_x, (n, in_dim), dtype=jnp.float32)

    # ---- path 1: use_bn=True, LeakyReLU (single row tile) ----
    blk_bn = SharedMLPBlock(in_dim, out_dim, use_bn=True, bn_momentum=0.1,
                            no_relu=False, key=k_w)
    out_bn = jax.block_until_ready(blk_bn(x))
    ref_bn = _ref_forward(x, blk_bn)
    assert out_bn.shape == (n, out_dim)
    assert jnp.allclose(out_bn, ref_bn, rtol=1e-2, atol=1e-2), \
        float(jnp.max(jnp.abs(out_bn - ref_bn)))

    # ---- path 2: use_bn=False (bias only), LeakyReLU, fully fused ----
    blk_nb = SharedMLPBlock(in_dim, out_dim, use_bn=False, bn_momentum=0.1,
                            no_relu=False, key=k_w)
    out_nb = jax.block_until_ready(blk_nb(x))
    ref_nb = _ref_forward(x, blk_nb)
    assert out_nb.shape == (n, out_dim)
    assert jnp.allclose(out_nb, ref_nb, rtol=1e-2, atol=1e-2), \
        float(jnp.max(jnp.abs(out_nb - ref_nb)))

    # ---- path 3: BN + ragged last row tile (exercises cdiv grid + stats mask) ----
    n2 = 200
    x2 = jax.random.normal(jax.random.PRNGKey(3), (n2, in_dim), dtype=jnp.float32)
    out_rg = jax.block_until_ready(blk_bn(x2, tm=128))           # 2 tiles, last partial
    ref_rg = _ref_forward(x2, blk_bn)
    assert out_rg.shape == (n2, out_dim)
    assert jnp.allclose(out_rg, ref_rg, rtol=1e-2, atol=1e-2), \
        float(jnp.max(jnp.abs(out_rg - ref_rg)))

    print("KERNEL_OK")
</pallas_src>

<mosaic_0001>
module attributes {stable_mosaic.version = 11 : i64} {
  func.func @_linear_stats_kernel(%arg0: i32, %arg1: memref<256x32xf32, #tpu.memory_space<vmem>>, %arg2: memref<32x64xbf16, #tpu.memory_space<vmem>>, %arg3: memref<1x1x64xf32, #tpu.memory_space<vmem>>, %arg4: memref<1x1x64xf32, #tpu.memory_space<vmem>>) attributes {dimension_semantics = [#tpu.dimension_semantics<parallel>], iteration_bounds = array<i64: 1>, scalar_prefetch = 0 : i64, scratch_operands = 0 : i64, tpu.core_type = #tpu.core_type<tc>, window_params = [{transform_indices = @transform_0, window_bounds = array<i64: 256, 32>}, {pipeline_mode = #tpu.pipeline_mode<synchronous>, transform_indices = @transform_1, window_bounds = array<i64: 32, 64>}, {transform_indices = @transform_2, window_bounds = array<i64: 1, 1, 64>}, {transform_indices = @transform_3, window_bounds = array<i64: 1, 1, 64>}]} {
    %c0 = arith.constant 0 : index
    %c0_0 = arith.constant 0 : index
    %0 = vector.load %arg1[%c0, %c0_0] : memref<256x32xf32, #tpu.memory_space<vmem>>, vector<256x32xf32>
    %1 = arith.truncf %0 : vector<256x32xf32> to vector<256x32xbf16>
    %c0_1 = arith.constant 0 : index
    %c0_2 = arith.constant 0 : index
    %2 = vector.load %arg2[%c0_1, %c0_2] : memref<32x64xbf16, #tpu.memory_space<vmem>>, vector<32x64xbf16>
    %cst = arith.constant dense<0.000000e+00> : vector<256x64xf32>
    %3 = tpu.matmul %1, %2, %cst {dimension_numbers = #tpu.dot_dimension_numbers<[1], [0], [0], [1], [0, 0, 1, 1], [], []>} : vector<256x32xbf16>, vector<32x64xbf16>, vector<256x64xf32> -> vector<256x64xf32>
    %cst_3 = arith.constant dense<0.000000e+00> : vector<64xf32>
    %4 = vector.multi_reduction <add>, %3, %cst_3 [0] : vector<256x64xf32> to vector<64xf32>
    %5 = vector.shape_cast %4 : vector<64xf32> to vector<1x1x64xf32>
    %c0_4 = arith.constant 0 : index
    %c0_5 = arith.constant 0 : index
    %c0_6 = arith.constant 0 : index
    %6 = vector.load %arg3[%c0_4, %c0_5, %c0_6] : memref<1x1x64xf32, #tpu.memory_space<vmem>>, vector<1x1x64xf32>
    tpu.vector_store %arg3[%c0_4, %c0_5, %c0_6], %5 {strides = array<i32>} : memref<1x1x64xf32, #tpu.memory_space<vmem>>, vector<1x1x64xf32>,
    %7 = arith.mulf %3, %3 : vector<256x64xf32>
    %cst_7 = arith.constant dense<0.000000e+00> : vector<64xf32>
    %8 = vector.multi_reduction <add>, %7, %cst_7 [0] : vector<256x64xf32> to vector<64xf32>
    %9 = vector.shape_cast %8 : vector<64xf32> to vector<1x1x64xf32>
    %c0_8 = arith.constant 0 : index
    %c0_9 = arith.constant 0 : index
    %c0_10 = arith.constant 0 : index
    %10 = vector.load %arg4[%c0_8, %c0_9, %c0_10] : memref<1x1x64xf32, #tpu.memory_space<vmem>>, vector<1x1x64xf32>
    tpu.vector_store %arg4[%c0_8, %c0_9, %c0_10], %9 {strides = array<i32>} : memref<1x1x64xf32, #tpu.memory_space<vmem>>, vector<1x1x64xf32>,
    return
  }
  func.func @transform_0(%arg0: i32) -> (i32, i32) {
    %c0_i32 = arith.constant 0 : i32
    %c0_i32_0 = arith.constant 0 : i32
    return %arg0, %c0_i32 : i32, i32
  }
  func.func @transform_1(%arg0: i32) -> (i32, i32) {
    %c0_i32 = arith.constant 0 : i32
    %c0_i32_0 = arith.constant 0 : i32
    %c0_i32_1 = arith.constant 0 : i32
    return %c0_i32, %c0_i32_0 : i32, i32
  }
  func.func @transform_2(%arg0: i32) -> (i32, i32, i32) {
    %c0_i32 = arith.constant 0 : i32
    %c0_i32_0 = arith.constant 0 : i32
    %c0_i32_1 = arith.constant 0 : i32
    return %arg0, %c0_i32, %c0_i32_0 : i32, i32, i32
  }
  func.func @transform_3(%arg0: i32) -> (i32, i32, i32) {
    %c0_i32 = arith.constant 0 : i32
    %c0_i32_0 = arith.constant 0 : i32
    %c0_i32_1 = arith.constant 0 : i32
    return %arg0, %c0_i32, %c0_i32_0 : i32, i32, i32
  }
}

</mosaic_0001>

<bundles_post_ra>
// kernel: tpu_custom_call.1
= control target key start
LH: loop header
LB: loop body
LE: loop exit
PB: predicated region body
PF: predicated region fallthrough
CT: control target
= control target key end

     0   :  { %9 = vsyncpa [#allocation3], 0  ;;  %vm80_vm0 = vcmask 261120   ;;  %s938_s0 = inlined_call_operand.vmem [shape: f32[256,32], index: 0, kind: input, shape index: {}]   ;;  %s939_s1 = inlined_call_operand.vmem [shape: bf16[32,64], index: 1, kind: input, shape index: {}]   ;;  %s940_s2 = inlined_call_operand.hbm [shape: f32[1,1,64], index: 2, kind: output, shape index: {0}]   ;;  %s941_s3 = inlined_call_operand.hbm [shape: f32[1,1,64], index: 3, kind: output, shape index: {1}]  }
   0x1   :  { %v570_v0 = vld [vmem:[%s939_s1] sm:$0xff]   ;;  %v571_v1 = vld [vmem:[%s939_s1 + $0x8] sm:$0xff]   ;;  %v18_v5 = vld [vmem:[%s938_s0 + $0x10] sm:$0xff] }
   0x2   :  { %528 = vmatprep.subr.bf16.mxu0 %v570_v0  ;;  %v16_v2 = vld [vmem:[%s938_s0] sm:$0xff]  ;;  %v17_v3 = vld [vmem:[%s938_s0 + $0x8] sm:$0xff]  ;;  %564 = vmatprep.subr.bf16.mxu1 %v570_v0  ;;  %v19_v6 = vld [vmem:[%s938_s0 + $0x18] sm:$0xff] }
   0x3   :  { %529 = vmatpush3.bf16.msra.mxu0 %v570_v0  ;;  %v48_v4 = vpack.c.bf16 %v17_v3, %v16_v2  ;;  %566 = vmatpush3.bf16.msra.mxu1 %v570_v0  ;;  %v20_v7 = vld [vmem:[%s938_s0 + $0x20] sm:$0xff]  ;;  %v21_v8 = vld [vmem:[%s938_s0 + $0x28] sm:$0xff]  ;;  %v49_v9 = vpack.c.bf16 %v19_v6, %v18_v5  ;;  %v34_v14 = vld [vmem:[%s938_s0 + $0x90] sm:$0xff] }
   0x4   :  { %530 = vmatprep.subr.bf16.mxu0 %v571_v1  ;;  %565 = vmatprep.subr.bf16.mxu1 %v571_v1  ;;  %v50_v10 = vpack.c.bf16 %v21_v8, %v20_v7  ;;  %v32_v11 = vld [vmem:[%s938_s0 + $0x80] sm:$0xff]  ;;  %v33_v12 = vld [vmem:[%s938_s0 + $0x88] sm:$0xff]  ;;  %v35_v15 = vld [vmem:[%s938_s0 + $0x98] sm:$0xff] }
   0x5   :  { %532 = vmatprep.mubr.msk.bf16.mxu0 %vm80_vm0, %v48_v4  ;;  %v56_v13 = vpack.c.bf16 %v33_v12, %v32_v11  ;;  %v36_v16 = vld [vmem:[%s938_s0 + $0xa0] sm:$0xff]  ;;  %v57_v17 = vpack.c.bf16 %v35_v15, %v34_v14  ;;  %v37_v18 = vld [vmem:[%s938_s0 + $0xa8] sm:$0xff]  ;;  %v22_v19 = vld [vmem:[%s938_s0 + $0x30] sm:$0xff] }
   0x6   :  { %v58_v20 = vpack.c.bf16 %v37_v18, %v36_v16  ;;  %v23_v21 = vld [vmem:[%s938_s0 + $0x38] sm:$0xff]  ;;  %v24_v22 = vld [vmem:[%s938_s0 + $0x40] sm:$0xff]  ;;  %v25_v23 = vld [vmem:[%s938_s0 + $0x48] sm:$0xff] }
   0x7   :  { %531 = vmatpush3.bf16.msra.mxu0 %v571_v1  ;;  %567 = vmatpush3.bf16.msra.mxu1 %v571_v1  ;;  %v38_v24 = vld [vmem:[%s938_s0 + $0xb0] sm:$0xff]  ;;  %v39_v25 = vld [vmem:[%s938_s0 + $0xb8] sm:$0xff] }
   0x8   :  { %548 = vmatprep.mubr.msk.bf16.mxu1 %vm80_vm0, %v56_v13 }
   0xa   :  { %533 = vmatmul.mubr.msk.bf16.vlgmr.msra.gmra.mrb[0].mxu0 %vm80_vm0, %v49_v9  ;;  %549 = vmatmul.mubr.msk.bf16.vlgmr.msra.gmra.mrb[0].mxu1 %vm80_vm0, %v57_v17 }
   0xb   :  { %536 = vmatprep.mubr.msk.bf16.mxu0 %vm80_vm0, %v50_v10  ;;  %552 = vmatprep.mubr.msk.bf16.mxu1 %vm80_vm0, %v58_v20 }
   0xc   :  { %10 = vsyncpa [#allocation5], 0  ;;  %v40_v26 = vld [vmem:[%s938_s0 + $0xc0] sm:$0xff]  ;;  %v41_v27 = vld [vmem:[%s938_s0 + $0xc8] sm:$0xff]  ;;  %v51_v28 = vpack.c.bf16 %v23_v21, %v22_v19  ;;  %v52_v29 = vpack.c.bf16 %v25_v23, %v24_v22  ;;  %v59_v30 = vpack.c.bf16 %v39_v25, %v38_v24  ;;  %vm290_vm1 = vcmask 523264   ;;  %s621_s24 = smov [#allocation4]  }
   0xd   :  { %v60_v31 = vpack.c.bf16 %v41_v27, %v40_v26  ;;  %v26_v32 = vld [vmem:[%s938_s0 + $0x50] sm:$0xff]  ;;  %v27_v33 = vld [vmem:[%s938_s0 + $0x58] sm:$0xff]  ;;  %v28_v34 = vld [vmem:[%s938_s0 + $0x60] sm:$0xff]  ;;  %vm360_vm2 = vcmask 516096   ;;  %s480_s25 = sshll.u32 %s621_s24, 4  ;;  %s905_s25 = int_to_ptr.vmem [resolvable:$true] %s480_s25 }
   0xe   :  { %v29_v35 = vld [vmem:[%s938_s0 + $0x68] sm:$0xff]  ;;  %v42_v36 = vld [vmem:[%s938_s0 + $0xd0] sm:$0xff]  ;;  %v43_v37 = vld [vmem:[%s938_s0 + $0xd8] sm:$0xff]  ;;  %v53_v40 = vpack.c.bf16 %v27_v33, %v26_v32 }
   0xf   :  { %v44_v38 = vld [vmem:[%s938_s0 + $0xe0] sm:$0xff]  ;;  %v45_v39 = vld [vmem:[%s938_s0 + $0xe8] sm:$0xff]  ;;  %v54_v41 = vpack.c.bf16 %v29_v35, %v28_v34  ;;  %v61_v42 = vpack.c.bf16 %v43_v37, %v42_v36  ;;  %v30_v44 = vld [vmem:[%s938_s0 + $0x70] sm:$0xff] }
  0x10   :  { %v62_v43 = vpack.c.bf16 %v45_v39, %v44_v38  ;;  %v31_v45 = vld [vmem:[%s938_s0 + $0x78] sm:$0xff]  ;;  %v46_v46 = vld [vmem:[%s938_s0 + $0xf0] sm:$0xff] }
  0x11   :  { %v47_v47 = vld [vmem:[%s938_s0 + $0xf8] sm:$0xff]  ;;  %v55_v48 = vpack.c.bf16 %v31_v45, %v30_v44  ;;  %s620_s0 = smov [#allocation2]  }
  0x12   :  { %537 = vmatmul.mubr.msk.bf16.gmra.mrb[4].mxu0 %vm80_vm0, %v51_v28  ;;  %553 = vmatmul.mubr.msk.bf16.gmra.mrb[4].mxu1 %vm80_vm0, %v59_v30  ;;  %v63_v49 = vpack.c.bf16 %v47_v47, %v46_v46  ;;  %s470_s1 = sshll.u32 %s620_s0, 4  ;;  %s471_s1 = int_to_ptr.vmem [resolvable:$true] %s470_s1 }
  0x13   :  { %540 = vmatprep.mubr.msk.bf16.mxu0 %vm80_vm0, %v52_v29  ;;  %556 = vmatprep.mubr.msk.bf16.mxu1 %vm80_vm0, %v60_v31  ;;  %s572_s26 = scalar_lea.vmem %s471_s1, 16  ;;  %s576_s27 = scalar_lea.vmem %s471_s1, 32 }
  0x14   :  { %p573_p0 = scmp.ne.s32.totalorder %s471_s1, %s572_s26  ;;  %p577_p1 = scmp.lt.s32.totalorder %s471_s1, %s471_s1 }
  0x15   :  { %p578_p2 = scmp.lt.s32.totalorder %s576_s27, %s572_s26 }
  0x17   :  { %p579_p3 = por %p578_p2, %p577_p1 }
  0x19   :  { %p580_p4 = pnand %p579_p3, %p573_p0 }
  0x1a   :  { %541 = vmatmul.mubr.msk.bf16.gmra.mrb[8].mxu0 %vm80_vm0, %v53_v40  ;;  %557 = vmatmul.mubr.msk.bf16.gmra.mrb[8].mxu1 %vm80_vm0, %v61_v42 }
  0x1b   :  { %544 = vmatprep.mubr.msk.bf16.mxu0 %vm80_vm0, %v54_v41  ;;  %560 = vmatprep.mubr.msk.bf16.mxu1 %vm80_vm0, %v62_v43 }
  0x22   :  { %545 = vmatmul.mubr.msk.bf16.gmra.mrb[12].mxu0 %vm80_vm0, %v55_v48  ;;  %561 = vmatmul.mubr.msk.bf16.gmra.mrb[12].mxu1 %vm80_vm0, %v63_v49 }
  0xdd   :  { %v534_v50 = vpop.f32.mrb[0].mxu0  ;;  %v760_v52 = vpop.f32.mrb[0].mxu1 }
  0xde   :  { %v163_v51 = vpop.f32.mrb[1].mxu0  ;;  %v762_v55 = vpop.f32.mrb[1].mxu1  ;;  %v364_v58 = vmul.f32 %v534_v50, %v534_v50  ;;  %v294_v0 = vsel %vm290_vm1, %v534_v50, 0.0 }
  0xdf   :  { %v362_v53 = vmul.f32 %v163_v51, %v163_v51  ;;  %v535_v54 = vpop.f32.mrb[2].mxu0  ;;  %v764_v57 = vpop.f32.mrb[2].mxu1  ;;  %v291_v59 = vsel %vm290_vm1, %v163_v51, 0.0 }
  0xe0   :  { %v166_v56 = vpop.f32.mrb[3].mxu0  ;;  %v768_v62 = vpop.f32.mrb[3].mxu1  ;;  %v365_v2 = vmul.f32 %v535_v54, %v535_v54  ;;  %v397_v6 = vsel %vm290_vm1, %v364_v58, 0.0  ;;  %v296_v7 = vsel %vm290_vm1, %v535_v54, 0.0 }
  0xe1   :  { %v292_v60 = vsel %vm290_vm1, %v166_v56, 0.0  ;;  %v363_v61 = vmul.f32 %v166_v56, %v166_v56  ;;  %v394_v1 = vsel %vm290_vm1, %v362_v53, 0.0 }
  0xe2   :  { %v293_v63 = vadd.f32 %v292_v60, %v291_v59  ;;  %v399_v13 = vsel %vm290_vm1, %v365_v2, 0.0 }
  0xe3   :  { %v395_v3 = vsel %vm290_vm1, %v363_v61, 0.0 }
  0xe4   :  { %v295_v4 = vadd.f32 %v294_v0, %v293_v63  ;;  %v396_v5 = vadd.f32 %v395_v3, %v394_v1 }
  0xe5   :  { %v538_v8 = vpop.f32.mrb[4].mxu0  ;;  %v775_v12 = vpop.f32.mrb[4].mxu1 }
  0xe6   :  { %v398_v9 = vadd.f32 %v397_v6, %v396_v5  ;;  %v179_v10 = vpop.f32.mrb[5].mxu0  ;;  %v297_v11 = vadd.f32 %v296_v7, %v295_v4  ;;  %v779_v17 = vpop.f32.mrb[5].mxu1  ;;  %v368_v22 = vmul.f32 %v538_v8, %v538_v8  ;;  %v302_v29 = vsel %vm290_vm1, %v538_v8, 0.0 }
  0xe7   :  { %v298_v14 = vsel %vm290_vm1, %v179_v10, 0.0  ;;  %v366_v15 = vmul.f32 %v179_v10, %v179_v10  ;;  %v539_v16 = vpop.f32.mrb[6].mxu0  ;;  %v781_v21 = vpop.f32.mrb[6].mxu1 }
  0xe8   :  { %v299_v18 = vadd.f32 %v298_v14, %v297_v11  ;;  %v400_v19 = vadd.f32 %v399_v13, %v398_v9  ;;  %v182_v20 = vpop.f32.mrb[7].mxu0  ;;  %v785_v26 = vpop.f32.mrb[7].mxu1  ;;  %v369_v30 = vmul.f32 %v539_v16, %v539_v16  ;;  %v405_v34 = vsel %vm290_vm1, %v368_v22, 0.0 }
  0xe9   :  { %v401_v23 = vsel %vm290_vm1, %v366_v15, 0.0  ;;  %v300_v24 = vsel %vm290_vm1, %v182_v20, 0.0  ;;  %v367_v25 = vmul.f32 %v182_v20, %v182_v20  ;;  %v304_v35 = vsel %vm290_vm1, %v539_v16, 0.0 }
  0xea   :  { %v402_v27 = vadd.f32 %v401_v23, %v400_v19  ;;  %v301_v28 = vadd.f32 %v300_v24, %v299_v18  ;;  %v407_v41 = vsel %vm290_vm1, %v369_v30, 0.0 }
  0xeb   :  { %v403_v31 = vsel %vm290_vm1, %v367_v25, 0.0 }
  0xec   :  { %v303_v32 = vadd.f32 %v302_v29, %v301_v28  ;;  %v404_v33 = vadd.f32 %v403_v31, %v402_v27 }
  0xed   :  { %v542_v36 = vpop.f32.mrb[8].mxu0  ;;  %v791_v40 = vpop.f32.mrb[8].mxu1 }
  0xee   :  { %v406_v37 = vadd.f32 %v405_v34, %v404_v33  ;;  %v195_v38 = vpop.f32.mrb[9].mxu0  ;;  %v305_v39 = vadd.f32 %v304_v35, %v303_v32  ;;  %v795_v45 = vpop.f32.mrb[9].mxu1  ;;  %v372_v50 = vmul.f32 %v542_v36, %v542_v36  ;;  %v310_v60 = vsel %vm290_vm1, %v542_v36, 0.0 }
  0xef   :  { %v306_v42 = vsel %vm290_vm1, %v195_v38, 0.0  ;;  %v370_v43 = vmul.f32 %v195_v38, %v195_v38  ;;  %v543_v44 = vpop.f32.mrb[10].mxu0  ;;  %v797_v49 = vpop.f32.mrb[10].mxu1  ;;  %v378_v32 = vmul.f32 %v762_v55, %v762_v55 }
  0xf0   :  { %v307_v46 = vadd.f32 %v306_v42, %v305_v39  ;;  %v408_v47 = vadd.f32 %v407_v41, %v406_v37  ;;  %v198_v48 = vpop.f32.mrb[11].mxu0  ;;  %v801_v56 = vpop.f32.mrb[11].mxu1  ;;  %v373_v61 = vmul.f32 %v543_v44, %v543_v44  ;;  %v413_v2 = vsel %vm290_vm1, %v372_v50, 0.0 }
  0xf1   :  { %v409_v51 = vsel %vm290_vm1, %v370_v43, 0.0  ;;  %v308_v53 = vsel %vm290_vm1, %v198_v48, 0.0  ;;  %v371_v54 = vmul.f32 %v198_v48, %v198_v48  ;;  %v312_v3 = vsel %vm290_vm1, %v543_v44, 0.0 }
  0xf2   :  { %v410_v58 = vadd.f32 %v409_v51, %v408_v47  ;;  %v309_v59 = vadd.f32 %v308_v53, %v307_v46  ;;  %v415_v9 = vsel %vm290_vm1, %v373_v61, 0.0  ;;  %v322_v37 = vsel %vm290_vm1, %v762_v55, 0.0 }
  0xf3   :  { %v411_v63 = vsel %vm290_vm1, %v371_v54, 0.0  ;;  %v425_v42 = vsel %vm290_vm1, %v378_v32, 0.0  ;;  %v379_v43 = vmul.f32 %v768_v62, %v768_v62  ;;  %v380_v47 = vmul.f32 %v760_v52, %v760_v52 }
  0xf4   :  { %v311_v0 = vadd.f32 %v310_v60, %v309_v59  ;;  %v412_v1 = vadd.f32 %v411_v63, %v410_v58  ;;  %v324_v48 = vsel %vm290_vm1, %v768_v62, 0.0  ;;  %v326_v55 = vsel %vm290_vm1, %v760_v52, 0.0 }
  0xf5   :  { %v546_v4 = vpop.f32.mrb[12].mxu0  ;;  %v807_v8 = vpop.f32.mrb[12].mxu1  ;;  %v381_v53 = vmul.f32 %v764_v57, %v764_v57  ;;  %v427_v54 = vsel %vm290_vm1, %v379_v43, 0.0  ;;  %v382_v58 = vmul.f32 %v779_v17, %v779_v17  ;;  %v429_v61 = vsel %vm290_vm1, %v380_v47, 0.0 }
  0xf6   :  { %v414_v5 = vadd.f32 %v413_v2, %v412_v1  ;;  %v211_v6 = vpop.f32.mrb[13].mxu0  ;;  %v313_v7 = vadd.f32 %v312_v3, %v311_v0  ;;  %v811_v14 = vpop.f32.mrb[13].mxu1  ;;  %v376_v20 = vmul.f32 %v546_v4, %v546_v4  ;;  %v318_v29 = vsel %vm290_vm1, %v546_v4, 0.0 }
  0xf7   :  { %v314_v10 = vsel %vm290_vm1, %v211_v6, 0.0  ;;  %v374_v11 = vmul.f32 %v211_v6, %v211_v6  ;;  %v547_v13 = vpop.f32.mrb[14].mxu0  ;;  %v813_v19 = vpop.f32.mrb[14].mxu1  ;;  %v328_v62 = vsel %vm290_vm1, %v764_v57, 0.0  ;;  %v330_v63 = vsel %vm290_vm1, %v779_v17, 0.0 }
  0xf8   :  { %v315_v15 = vadd.f32 %v314_v10, %v313_v7  ;;  %v416_v16 = vadd.f32 %v415_v9, %v414_v5  ;;  %v214_v18 = vpop.f32.mrb[15].mxu0  ;;  %v817_v25 = vpop.f32.mrb[15].mxu1  ;;  %v377_v30 = vmul.f32 %v547_v13, %v547_v13  ;;  %v421_v35 = vsel %vm290_vm1, %v376_v20, 0.0 }
  0xf9   :  { %v417_v22 = vsel %vm290_vm1, %v374_v11, 0.0  ;;  %v316_v23 = vsel %vm290_vm1, %v214_v18, 0.0  ;;  %v375_v24 = vmul.f32 %v214_v18, %v214_v18  ;;  %v320_v36 = vsel %vm290_vm1, %v547_v13, 0.0 }
  0xfa   :  { %v418_v27 = vadd.f32 %v417_v22, %v416_v16  ;;  %v317_v28 = vadd.f32 %v316_v23, %v315_v15  ;;  %v423_v41 = vsel %vm290_vm1, %v377_v30, 0.0  ;;  %v431_v1 = vsel %vm290_vm1, %v381_v53, 0.0 }
  0xfb   :  { %v419_v31 = vsel %vm290_vm1, %v375_v24, 0.0  ;;  %v433_v2 = vsel %vm290_vm1, %v382_v58, 0.0  ;;  %v383_v3 = vmul.f32 %v785_v26, %v785_v26  ;;  %v384_v6 = vmul.f32 %v775_v12, %v775_v12 }
  0xfc   :  { %v319_v33 = vadd.f32 %v318_v29, %v317_v28  ;;  %v420_v34 = vadd.f32 %v419_v31, %v418_v27  ;;  %v332_v57 = vsel %vm290_vm1, %v785_v26, 0.0  ;;  %v334_v17 = vsel %vm290_vm1, %v775_v12, 0.0 }
  0xfd   :  { %v385_v10 = vmul.f32 %v781_v21, %v781_v21  ;;  %v435_v11 = vsel %vm290_vm1, %v383_v3, 0.0  ;;  %v386_v13 = vmul.f32 %v795_v45, %v795_v45  ;;  %v437_v18 = vsel %vm290_vm1, %v384_v6, 0.0 }
  0xfe   :  { %v422_v38 = vadd.f32 %v421_v35, %v420_v34  ;;  %v321_v39 = vadd.f32 %v320_v36, %v319_v33  ;;  %v336_v26 = vsel %vm290_vm1, %v781_v21, 0.0  ;;  %v338_v20 = vsel %vm290_vm1, %v795_v45, 0.0 }
  0xff   :  { %v439_v23 = vsel %vm290_vm1, %v385_v10, 0.0  ;;  %v441_v24 = vsel %vm290_vm1, %v386_v13, 0.0  ;;  %v387_v27 = vmul.f32 %v801_v56, %v801_v56  ;;  %v388_v30 = vmul.f32 %v791_v40, %v791_v40 }
 0x100   :  { %v323_v44 = vadd.f32 %v322_v37, %v321_v39  ;;  %v424_v46 = vadd.f32 %v423_v41, %v422_v38  ;;  %v340_v21 = vsel %vm290_vm1, %v801_v56, 0.0  ;;  %v342_v45 = vsel %vm290_vm1, %v791_v40, 0.0 }
 0x101   :  { %v389_v33 = vmul.f32 %v797_v49, %v797_v49  ;;  %v443_v34 = vsel %vm290_vm1, %v387_v27, 0.0  ;;  %v390_v35 = vmul.f32 %v811_v14, %v811_v14  ;;  %v445_v38 = vsel %vm290_vm1, %v388_v30, 0.0 }
 0x102   :  { %v426_v50 = vadd.f32 %v425_v42, %v424_v46  ;;  %v325_v51 = vadd.f32 %v324_v48, %v323_v44  ;;  %v344_v56 = vsel %vm290_vm1, %v797_v49, 0.0  ;;  %v346_v39 = vsel %vm290_vm1, %v811_v14, 0.0 }
 0x103   :  { %v447_v42 = vsel %vm290_vm1, %v389_v33, 0.0  ;;  %v449_v43 = vsel %vm290_vm1, %v390_v35, 0.0  ;;  %v391_v44 = vmul.f32 %v817_v25, %v817_v25  ;;  %v392_v48 = vmul.f32 %v807_v8, %v807_v8 }
 0x104   :  { %v327_v59 = vadd.f32 %v326_v55, %v325_v51  ;;  %v428_v60 = vadd.f32 %v427_v54, %v426_v50  ;;  %v348_v49 = vsel %vm290_vm1, %v817_v25, 0.0  ;;  %v350_v14 = vsel %vm290_vm1, %v807_v8, 0.0 }
 0x105   :  { %v393_v55 = vmul.f32 %v813_v19, %v813_v19  ;;  %v451_v53 = vsel %vm290_vm1, %v391_v44, 0.0 }
 0x106   :  { %v430_v0 = vadd.f32 %v429_v61, %v428_v60  ;;  %v329_v52 = vadd.f32 %v328_v62, %v327_v59  ;;  %v453_v59 = vsel %vm290_vm1, %v392_v48, 0.0  ;;  %v352_v60 = vsel %vm290_vm1, %v813_v19, 0.0 }
 0x107   :  { %v455_v25 = vsel %vm290_vm1, %v393_v55, 0.0 }
 0x108   :  { %v331_v4 = vadd.f32 %v330_v63, %v329_v52  ;;  %v432_v5 = vadd.f32 %v431_v1, %v430_v0 }
 0x10a   :  { %v434_v7 = vadd.f32 %v433_v2, %v432_v5  ;;  %v333_v9 = vadd.f32 %v332_v57, %v331_v4 }
 0x10c   :  { %v335_v15 = vadd.f32 %v334_v17, %v333_v9  ;;  %v436_v16 = vadd.f32 %v435_v11, %v434_v7 }
 0x10e   :  { %v438_v22 = vadd.f32 %v437_v18, %v436_v16  ;;  %v337_v12 = vadd.f32 %v336_v26, %v335_v15 }
 0x110   :  { %v339_v28 = vadd.f32 %v338_v20, %v337_v12  ;;  %v440_v29 = vadd.f32 %v439_v23, %v438_v22 }
 0x112   :  { %v442_v31 = vadd.f32 %v441_v24, %v440_v29  ;;  %v341_v32 = vadd.f32 %v340_v21, %v339_v28 }
 0x114   :  { %v343_v36 = vadd.f32 %v342_v45, %v341_v32  ;;  %v444_v37 = vadd.f32 %v443_v34, %v442_v31 }
 0x116   :  { %v446_v41 = vadd.f32 %v445_v38, %v444_v37  ;;  %v345_v40 = vadd.f32 %v344_v56, %v343_v36 }
 0x118   :  { %v347_v46 = vadd.f32 %v346_v39, %v345_v40  ;;  %v448_v47 = vadd.f32 %v447_v42, %v446_v41 }
 0x11a   :  { %v450_v50 = vadd.f32 %v449_v43, %v448_v47  ;;  %v349_v51 = vadd.f32 %v348_v49, %v347_v46 }
 0x11c   :  { %v351_v54 = vadd.f32 %v350_v14, %v349_v51  ;;  %v452_v58 = vadd.f32 %v451_v53, %v450_v50 }
 0x11e   :  { %v353_v61 = vadd.f32 %v352_v60, %v351_v54  ;;  %v454_v62 = vadd.f32 %v453_v59, %v452_v58 }
 0x120   :  { %v354_v63 = vrot.slane %v353_v61, 4  ;;  %v456_v0 = vadd.f32 %v455_v25, %v454_v62 }
 0x122   :  { %v457_v52 = vrot.slane %v456_v0, 4  ;;  %v355_v8 = vadd.f32 %v354_v63, %v353_v61 }
 0x124   :  { %v356_v1 = vrot.slane %v355_v8, 2  ;;  %v458_v2 = vadd.f32 %v457_v52, %v456_v0 }
 0x126   :  { %v357_v3 = vadd.f32 %v356_v1, %v355_v8  ;;  %v459_v4 = vrot.slane %v458_v2, 2 }
 0x128   :  { %v358_v5 = vrot.slane %v357_v3, 1  ;;  %v460_v6 = vadd.f32 %v459_v4, %v458_v2 }
 0x12a   :  { %v359_v19 = vadd.f32 %v358_v5, %v357_v3  ;;  %v461_v57 = vrot.slane %v460_v6, 1 }
 0x12c   :  { %361 = vst.msk [vmem:[#allocation2] sm:$0x1] %vm360_vm2, %v359_v19  ;;  %v462_v7 = vadd.f32 %v461_v57, %v460_v6 }
 0x12d   :  { %583 = shalt.err (!%p580_p4)
}
 0x12e   :  { %s584_s30 = scalar_lea.hbm %s940_s2, 16 }
 0x12f   :  { %p585_p5 = scmp.ne.s32.totalorder %s940_s2, %s584_s30  ;;  %p588_p6 = scmp.lt.u32.totalorder %s584_s30, %s940_s2 }
 0x131   :  { %p590_p7 = pnand %p588_p6, %p585_p5 }
 0x133   :  { %593 = shalt.err (!%p590_p7)
}
 0x134   :  { %473 = dma.vmem_to_hbm [thread:$0]  %s471_s1, 16, %s940_s2, [#allocation3]   ;;  %463 = vst.msk [vmem:[#allocation4] sm:$0x1] %vm360_vm2, %v462_v7 }
 0x135   :  { %s594_s10 = scalar_lea.vmem %s905_s25, 16  ;;  %s598_s11 = scalar_lea.vmem %s905_s25, 32 }
 0x136   :  { %p595_p8 = scmp.ne.s32.totalorder %s905_s25, %s594_s10  ;;  %p599_p9 = scmp.lt.s32.totalorder %s905_s25, %s905_s25 }
 0x137   :  { %p600_p10 = scmp.lt.s32.totalorder %s598_s11, %s594_s10 }
 0x139   :  { %p601_p11 = por %p600_p10, %p599_p9 }
 0x13b   :  { %p602_p12 = pnand %p601_p11, %p595_p8 }
 0x13d   :  { %605 = shalt.err (!%p602_p12)
}
 0x13e   :  { %s606_s14 = scalar_lea.hbm %s941_s3, 16 }
 0x13f   :  { %p607_p13 = scmp.ne.s32.totalorder %s941_s3, %s606_s14  ;;  %p610_p0 = scmp.lt.u32.totalorder %s606_s14, %s941_s3 }
 0x141   :  { %p612_p1 = pnand %p610_p0, %p607_p13 }
 0x143   :  { %615 = shalt.err (!%p612_p1)
}
 0x144   :  { %483 = dma.vmem_to_hbm [thread:$0]  %s905_s25, 16, %s941_s3, [#allocation5]  }
 0x145   :  { %616 = dma.done.wait [#allocation3], 16  }
 0x146   :  { %617 = vsyncadd [#allocation3], 4294967280 }
 0x147   :  { %618 = dma.done.wait [#allocation5], 16  }
 0x148   :  { %619 = vsyncadd [#allocation5], 4294967280 }
 0x149   :  { %490 = vsyncpa [#allocation3], 1 }
 0x14a   :  { %491 = vsyncpa [#allocation5], 1 }

</bundles_post_ra>
